<compile_context>
chip_gen: v7x
topology: tpu7x:2x2x1
jax: 0.10.0
libtpu: 0.0.40
codegen_flags: <defaults>
</compile_context>

<pallas_src>
import functools
import math

import jax
import jax.numpy as jnp
from jax.experimental import pallas as pl
from jax.experimental.pallas import tpu as pltpu

_MXU_DTYPE = jnp.bfloat16  # dot-input dtype for the heavy matmuls; accumulation stays f32


# ----------------------------- in-kernel helpers ------------------------------

def _erf(x):
    # Abramowitz & Stegun 7.1.26 rational approximation, |error| <= 1.5e-7.
    # mul/add/exp/where + one EUP reciprocal -> clean Mosaic lowering, exp/rcp on EUP.
    a1, a2, a3, a4, a5 = 0.254829592, -0.284496736, 1.421413741, -1.453152027, 1.061405429
    p = 0.3275911
    ax = jnp.abs(x)
    t = pl.reciprocal(1.0 + p * ax, approx=True)
    poly = ((((a5 * t + a4) * t + a3) * t + a2) * t + a1) * t
    y = 1.0 - poly * jnp.exp(-ax * ax)
    return jnp.where(x < 0, -y, y)


def _gelu_exact(x):
    # torch nn.GELU() default (exact, erf-based).
    return 0.5 * x * (1.0 + _erf(x * 0.7071067811865476))


# --------------------------------- kernel -------------------------------------

def fan_model_kernel(x_ref, w_emb_ref, b_emb_ref,
                     w_pg_ref, b_pg_ref, r_ref,
                     w_out_ref, b_out_ref, out_ref,
                     *, num_fan_layers, half):
    """Whole forward pass for one batch tile.

    Shapes:
      x_ref     : (Bt, D_in)  f32
      w_emb_ref : (D_in, H)   f32        b_emb_ref : (1, H)  f32
      w_pg_ref  : (L, H, H)   bf16       b_pg_ref  : (L, 1, H)  f32   (packed [Wp|Wp|Wg], [bp+phi_s|bp+phi_c|bg])
      r_ref     : (L, 1, H/2) f32        (packed amplitudes [R_sin | R_cos])
      w_out_ref : (H, OUT_PAD) bf16      b_out_ref : (1, OUT_PAD) f32  (zero-padded to 128 lanes)
      out_ref   : (Bt, OUT_PAD) f32
    """
    # Embedding (K = D_in is tiny -> keep f32; negligible MXU cost, better precision).
    h = jnp.dot(x_ref[...], w_emb_ref[...],
                preferred_element_type=jnp.float32) + b_emb_ref[...]
    # Carry activations as two lane-aligned 128-wide halves; every later dot is a K-split
    # of two accumulated dots -> no jnp.concatenate / extra (Bt, H) copy per layer.
    left = h[:, :half]
    right = h[:, half:]

    # Static unroll is the right choice for small L (demo: L = 2); for L >> 2 a
    # lax.fori_loop carrying (left, right) with dynamic w_pg_ref[l] indexing bounds
    # vreg live ranges better.
    for l in range(num_fan_layers):
        w_full = w_pg_ref[l]                                   # (H, H) bf16, VMEM-resident
        z = (jnp.dot(left.astype(_MXU_DTYPE), w_full[:half, :],
                     preferred_element_type=jnp.float32)
             + jnp.dot(right.astype(_MXU_DTYPE), w_full[half:, :],
                       preferred_element_type=jnp.float32)
             + b_pg_ref[l])                                    # (Bt, H) f32
        # 2x2 basis folded to amplitude/phase at pack time (phase lives in b_pg):
        # [sin_t | cos_t] = sin(z_trig) * R  -- single sin + mul, no cos pass.
        left = jnp.sin(z[:, :half]) * r_ref[l]                 # (Bt, H/2)
        right = _gelu_exact(z[:, half:])                       # (Bt, H/2)

    w_out = w_out_ref[...]                                     # (H, OUT_PAD) bf16
    out = (jnp.dot(left.astype(_MXU_DTYPE), w_out[:half, :],
                   preferred_element_type=jnp.float32)
           + jnp.dot(right.astype(_MXU_DTYPE), w_out[half:, :],
                     preferred_element_type=jnp.float32)
           + b_out_ref[...])
    out_ref[...] = out


# ------------------------------ host-side glue --------------------------------

def _ensure_compatible_input(src, in_features):
    """JAX port of the torch helper (expand singleton / flatten 3D+ / pad / truncate)."""
    if src.ndim == 2 and src.shape[1] == 1 and in_features > 1:
        src = jnp.broadcast_to(src, (src.shape[0], in_features))
    if src.ndim >= 3:
        src = src.reshape(src.shape[0], -1)
    if src.shape[1] > in_features:
        src = src[:, :in_features]
    elif src.shape[1] < in_features:
        pad = jnp.zeros((src.shape[0], in_features - src.shape[1]), src.dtype)
        src = jnp.concatenate([src, pad], axis=1)
    return src


def init_params(key, input_dim, hidden_dim, output_dim, num_layers):
    """Deterministic synthetic parameters matching the torch module's shapes."""
    assert hidden_dim % 4 == 0, "hidden_dim must be divisible by 4 (2*p_dim + g_dim == H)"
    p_dim = hidden_dim // 4
    g_dim = hidden_dim // 2
    L = num_layers - 1
    keys = jax.random.split(key, 3 * L + 2)

    def lin(k, fan_in, fan_out):
        bound = 1.0 / math.sqrt(fan_in)
        kw, kb = jax.random.split(k)
        w = jax.random.uniform(kw, (fan_in, fan_out), jnp.float32, -bound, bound)
        b = jax.random.uniform(kb, (1, fan_out), jnp.float32, -bound, bound)
        return w, b

    w_emb, b_emb = lin(keys[0], input_dim, hidden_dim)

    wp, bp, wg, bg, basis = [], [], [], [], []
    for l in range(L):
        wpl, bpl = lin(keys[1 + 3 * l], hidden_dim, p_dim)
        wgl, bgl = lin(keys[2 + 3 * l], hidden_dim, g_dim)
        eye = jnp.broadcast_to(jnp.eye(2, dtype=jnp.float32), (p_dim, 2, 2))
        bas = eye + 0.01 * jax.random.normal(keys[3 + 3 * l], (p_dim, 2, 2), jnp.float32)
        wp.append(wpl); bp.append(bpl); wg.append(wgl); bg.append(bgl); basis.append(bas)

    w_out, b_out = lin(keys[-1], hidden_dim, output_dim)

    return dict(w_emb=w_emb, b_emb=b_emb, wp=wp, bp=bp, wg=wg, bg=bg, basis=basis,
                w_out=w_out, b_out=b_out,
                input_dim=input_dim, hidden_dim=hidden_dim, output_dim=output_dim,
                p_dim=p_dim, g_dim=g_dim, L=L)


def pack_params(params):
    """Host-side packing into MXU/lane-friendly tensors.

    * W_layer = [Wp | Wp | Wg]  (H, H), bf16 for the MXU.
    * 2x2 basis -> amplitude R and phase phi per column block; phi folded into the bias.
    * Output projection zero-padded to a 128-lane-dense block.
    """
    H = params["hidden_dim"]
    L = params["L"]
    out_dim = params["output_dim"]

    w_pg, b_pg, amp = [], [], []
    for l in range(L):
        T = params["basis"][l]                                   # (P, 2, 2)
        # sin_t = sin(p)*T00 + cos(p)*T10 = R_sin * sin(p + phi_sin)
        r_sin = jnp.sqrt(T[:, 0, 0] ** 2 + T[:, 1, 0] ** 2)
        phi_sin = jnp.arctan2(T[:, 1, 0], T[:, 0, 0])
        # cos_t = sin(p)*T01 + cos(p)*T11 = R_cos * sin(p + phi_cos)
        r_cos = jnp.sqrt(T[:, 0, 1] ** 2 + T[:, 1, 1] ** 2)
        phi_cos = jnp.arctan2(T[:, 1, 1], T[:, 0, 1])

        w_pg.append(jnp.concatenate(
            [params["wp"][l], params["wp"][l], params["wg"][l]], axis=1))        # (H, H)
        b_pg.append(jnp.concatenate(
            [params["bp"][l] + phi_sin[None, :],
             params["bp"][l] + phi_cos[None, :],
             params["bg"][l]], axis=1))                                          # (1, H)
        amp.append(jnp.concatenate([r_sin, r_cos])[None, :])                     # (1, H/2)

    w_pg = jnp.stack(w_pg).astype(_MXU_DTYPE)        # (L, H, H)   bf16
    b_pg = jnp.stack(b_pg)                           # (L, 1, H)   f32
    amp = jnp.stack(amp)                             # (L, 1, H/2) f32

    opad = max(128, ((out_dim + 127) // 128) * 128)  # lane-dense output stores
    w_out_pad = (jnp.zeros((H, opad), jnp.float32)
                 .at[:, :out_dim].set(params["w_out"]).astype(_MXU_DTYPE))
    b_out_pad = jnp.zeros((1, opad), jnp.float32).at[:, :out_dim].set(params["b_out"])

    return dict(w_emb=params["w_emb"], b_emb=params["b_emb"],
                w_pg=w_pg, b_pg=b_pg, amp=amp,
                w_out_pad=w_out_pad, b_out_pad=b_out_pad,
                half=H // 2, L=L, out_pad=opad,
                input_dim=params["input_dim"], hidden_dim=H, output_dim=out_dim)


def _pick_batch_tile(B):
    """Sublane-aligned batch tile: big enough to amortize per-step overhead, and >= 2 grid
    steps when B allows so ('parallel',) can shard across both v7x TensorCores."""
    rounded = max(8, ((B + 7) // 8) * 8)
    if rounded <= 16:
        return rounded
    half = ((rounded + 15) // 16) * 8      # ceil(rounded/2) rounded up to a multiple of 8
    return min(512, half)


def fan_model_forward(src, packed, *, batch_tile=None):
    """Input massaging in plain JAX; the whole hot path is one Pallas kernel."""
    x = _ensure_compatible_input(src, packed["input_dim"]).astype(jnp.float32)
    B = x.shape[0]
    d_in = packed["input_dim"]
    opad = packed["out_pad"]

    bt = batch_tile if batch_tile is not None else _pick_batch_tile(B)
    bt = max(8, (bt // 8) * 8)
    b_pad = ((B + bt - 1) // bt) * bt
    if b_pad != B:
        x = jnp.concatenate([x, jnp.zeros((b_pad - B, d_in), x.dtype)], axis=0)
    grid = (b_pad // bt,)

    kernel = functools.partial(fan_model_kernel,
                               num_fan_layers=packed["L"],
                               half=packed["half"])

    def const2(i):
        return (0, 0)

    def const3(i):
        return (0, 0, 0)

    out = pl.pallas_call(
        kernel,
        out_shape=jax.ShapeDtypeStruct((b_pad, opad), jnp.float32),
        grid=grid,
        in_specs=[
            pl.BlockSpec((bt, d_in), lambda i: (i, 0)),              # x: tiled over batch
            pl.BlockSpec(packed["w_emb"].shape, const2),             # weights: VMEM-resident
            pl.BlockSpec(packed["b_emb"].shape, const2),
            pl.BlockSpec(packed["w_pg"].shape, const3),
            pl.BlockSpec(packed["b_pg"].shape, const3),
            pl.BlockSpec(packed["amp"].shape, const3),
            pl.BlockSpec(packed["w_out_pad"].shape, const2),
            pl.BlockSpec(packed["b_out_pad"].shape, const2),
        ],
        out_specs=pl.BlockSpec((bt, opad), lambda i: (i, 0)),
        compiler_params=pltpu.CompilerParams(
            dimension_semantics=("parallel",),
            vmem_limit_bytes=32 * 1024 * 1024),   # fits v7x's 64 MiB/TC with large margin
    )(x, packed["w_emb"], packed["b_emb"],
      packed["w_pg"], packed["b_pg"], packed["amp"],
      packed["w_out_pad"], packed["b_out_pad"])

    return out[:B, :packed["output_dim"]]


# ------------------------------ pure-JAX reference -----------------------------

def fan_model_reference(src, params):
    """Unfused f32 reference mirroring the torch module exactly (exact erf GELU)."""
    x = _ensure_compatible_input(src, params["input_dim"]).astype(jnp.float32)
    h = x @ params["w_emb"] + params["b_emb"]
    for l in range(params["L"]):
        p = h @ params["wp"][l] + params["bp"][l]
        g = jax.nn.gelu(h @ params["wg"][l] + params["bg"][l], approximate=False)
        sin_p, cos_p = jnp.sin(p), jnp.cos(p)
        T = params["basis"][l]
        sin_t = sin_p * T[:, 0, 0] + cos_p * T[:, 1, 0]
        cos_t = sin_p * T[:, 0, 1] + cos_p * T[:, 1, 1]
        h = jnp.concatenate([sin_t, cos_t, g], axis=-1)
    return h @ params["w_out"] + params["b_out"]


# ----------------------------------- main --------------------------------------

if __name__ == "__main__":
    key = jax.random.PRNGKey(0)
    k_param, k_x = jax.random.split(key)

    INPUT_DIM, HIDDEN_DIM, OUTPUT_DIM, NUM_LAYERS = 4, 256, 8, 3
    BATCH = 8

    params = init_params(k_param, INPUT_DIM, HIDDEN_DIM, OUTPUT_DIM, NUM_LAYERS)
    packed = pack_params(params)
    x = jax.random.normal(k_x, (BATCH, INPUT_DIM), jnp.float32)

    out = jax.block_until_ready(fan_model_forward(x, packed))
    ref = fan_model_reference(x, params)

    assert out.shape == (BATCH, OUTPUT_DIM), out.shape
    # bf16 MXU matmuls (f32 accumulate) relax the achievable tolerance vs the f32 reference.
    max_err = float(jnp.max(jnp.abs(out - ref)))
    assert max_err < 5e-2, max_err
    print("KERNEL_OK")
</pallas_src>

<mosaic_0001>
module attributes {stable_mosaic.version = 11 : i64} {
  func.func @fan_model_kernel(%arg0: i32, %arg1: memref<8x4xf32, #tpu.memory_space<vmem>>, %arg2: memref<4x256xf32, #tpu.memory_space<vmem>>, %arg3: memref<1x256xf32, #tpu.memory_space<vmem>>, %arg4: memref<2x256x256xbf16, #tpu.memory_space<vmem>>, %arg5: memref<2x1x256xf32, #tpu.memory_space<vmem>>, %arg6: memref<2x1x128xf32, #tpu.memory_space<vmem>>, %arg7: memref<256x128xbf16, #tpu.memory_space<vmem>>, %arg8: memref<1x128xf32, #tpu.memory_space<vmem>>, %arg9: memref<8x128xf32, #tpu.memory_space<vmem>>) attributes {dimension_semantics = [#tpu.dimension_semantics<parallel>], iteration_bounds = array<i64: 1>, scalar_prefetch = 0 : i64, scratch_operands = 0 : i64, tpu.core_type = #tpu.core_type<tc>, window_params = [{transform_indices = @transform_0, window_bounds = array<i64: 8, 4>}, {pipeline_mode = #tpu.pipeline_mode<synchronous>, transform_indices = @transform_1, window_bounds = array<i64: 4, 256>}, {pipeline_mode = #tpu.pipeline_mode<synchronous>, transform_indices = @transform_2, window_bounds = array<i64: 1, 256>}, {pipeline_mode = #tpu.pipeline_mode<synchronous>, transform_indices = @transform_3, window_bounds = array<i64: 2, 256, 256>}, {pipeline_mode = #tpu.pipeline_mode<synchronous>, transform_indices = @transform_4, window_bounds = array<i64: 2, 1, 256>}, {pipeline_mode = #tpu.pipeline_mode<synchronous>, transform_indices = @transform_5, window_bounds = array<i64: 2, 1, 128>}, {pipeline_mode = #tpu.pipeline_mode<synchronous>, transform_indices = @transform_6, window_bounds = array<i64: 256, 128>}, {pipeline_mode = #tpu.pipeline_mode<synchronous>, transform_indices = @transform_7, window_bounds = array<i64: 1, 128>}, {transform_indices = @transform_8, window_bounds = array<i64: 8, 128>}]} {
    %c0 = arith.constant 0 : index
    %c0_0 = arith.constant 0 : index
    %0 = vector.load %arg1[%c0, %c0_0] : memref<8x4xf32, #tpu.memory_space<vmem>>, vector<8x4xf32>
    %c0_1 = arith.constant 0 : index
    %c0_2 = arith.constant 0 : index
    %1 = vector.load %arg2[%c0_1, %c0_2] : memref<4x256xf32, #tpu.memory_space<vmem>>, vector<4x256xf32>
    %cst = arith.constant dense<0.000000e+00> : vector<8x256xf32>
    %2 = tpu.matmul %0, %1, %cst {dimension_numbers = #tpu.dot_dimension_numbers<[1], [0], [0], [1], [0, 0, 1, 1], [], []>} : vector<8x4xf32>, vector<4x256xf32>, vector<8x256xf32> -> vector<8x256xf32>
    %c0_3 = arith.constant 0 : index
    %c0_4 = arith.constant 0 : index
    %3 = vector.load %arg3[%c0_3, %c0_4] : memref<1x256xf32, #tpu.memory_space<vmem>>, vector<1x256xf32>
    %4 = vector.broadcast %3 : vector<1x256xf32> to vector<8x256xf32>
    %5 = arith.addf %2, %4 : vector<8x256xf32>
    %6 = vector.extract_strided_slice %5 {offsets = [0, 0], sizes = [8, 128], strides = [1, 1]} : vector<8x256xf32> to vector<8x128xf32>
    %7 = vector.extract_strided_slice %5 {offsets = [0, 128], sizes = [8, 128], strides = [1, 1]} : vector<8x256xf32> to vector<8x128xf32>
    %c0_5 = arith.constant 0 : index
    %c0_6 = arith.constant 0 : index
    %c0_7 = arith.constant 0 : index
    %8 = vector.load %arg4[%c0_5, %c0_6, %c0_7] : memref<2x256x256xbf16, #tpu.memory_space<vmem>>, vector<1x256x256xbf16>
    %9 = vector.shape_cast %8 : vector<1x256x256xbf16> to vector<256x256xbf16>
    %10 = arith.truncf %6 : vector<8x128xf32> to vector<8x128xbf16>
    %11 = vector.extract_strided_slice %9 {offsets = [0, 0], sizes = [128, 256], strides = [1, 1]} : vector<256x256xbf16> to vector<128x256xbf16>
    %cst_8 = arith.constant dense<0.000000e+00> : vector<8x256xf32>
    %12 = tpu.matmul %10, %11, %cst_8 {dimension_numbers = #tpu.dot_dimension_numbers<[1], [0], [0], [1], [0, 0, 1, 1], [], []>} : vector<8x128xbf16>, vector<128x256xbf16>, vector<8x256xf32> -> vector<8x256xf32>
    %13 = arith.truncf %7 : vector<8x128xf32> to vector<8x128xbf16>
    %14 = vector.extract_strided_slice %9 {offsets = [128, 0], sizes = [128, 256], strides = [1, 1]} : vector<256x256xbf16> to vector<128x256xbf16>
    %cst_9 = arith.constant dense<0.000000e+00> : vector<8x256xf32>
    %15 = tpu.matmul %13, %14, %cst_9 {dimension_numbers = #tpu.dot_dimension_numbers<[1], [0], [0], [1], [0, 0, 1, 1], [], []>} : vector<8x128xbf16>, vector<128x256xbf16>, vector<8x256xf32> -> vector<8x256xf32>
    %16 = arith.addf %12, %15 : vector<8x256xf32>
    %c0_10 = arith.constant 0 : index
    %c0_11 = arith.constant 0 : index
    %c0_12 = arith.constant 0 : index
    %17 = vector.load %arg5[%c0_10, %c0_11, %c0_12] : memref<2x1x256xf32, #tpu.memory_space<vmem>>, vector<1x1x256xf32>
    %18 = vector.shape_cast %17 : vector<1x1x256xf32> to vector<1x256xf32>
    %19 = vector.broadcast %18 : vector<1x256xf32> to vector<8x256xf32>
    %20 = arith.addf %16, %19 : vector<8x256xf32>
    %21 = vector.extract_strided_slice %20 {offsets = [0, 0], sizes = [8, 128], strides = [1, 1]} : vector<8x256xf32> to vector<8x128xf32>
    %22 = math.sin %21 : vector<8x128xf32>
    %c0_13 = arith.constant 0 : index
    %c0_14 = arith.constant 0 : index
    %c0_15 = arith.constant 0 : index
    %23 = vector.load %arg6[%c0_13, %c0_14, %c0_15] : memref<2x1x128xf32, #tpu.memory_space<vmem>>, vector<1x1x128xf32>
    %24 = vector.shape_cast %23 : vector<1x1x128xf32> to vector<1x128xf32>
    %25 = vector.broadcast %24 : vector<1x128xf32> to vector<8x128xf32>
    %26 = arith.mulf %22, %25 : vector<8x128xf32>
    %27 = vector.extract_strided_slice %20 {offsets = [0, 128], sizes = [8, 128], strides = [1, 1]} : vector<8x256xf32> to vector<8x128xf32>
    %cst_16 = arith.constant 5.000000e-01 : f32
    %28 = vector.broadcast %cst_16 : f32 to vector<8x128xf32>
    %29 = arith.mulf %28, %27 : vector<8x128xf32>
    %cst_17 = arith.constant 0.707106769 : f32
    %30 = vector.broadcast %cst_17 : f32 to vector<8x128xf32>
    %31 = arith.mulf %27, %30 : vector<8x128xf32>
    %32 = math.absf %31 : vector<8x128xf32>
    %cst_18 = arith.constant 0.327591091 : f32
    %33 = vector.broadcast %cst_18 : f32 to vector<8x128xf32>
    %34 = arith.mulf %33, %32 : vector<8x128xf32>
    %cst_19 = arith.constant 1.000000e+00 : f32
    %35 = vector.broadcast %cst_19 : f32 to vector<8x128xf32>
    %36 = arith.addf %35, %34 : vector<8x128xf32>
    %37 = tpu.reciprocal %36 {approx = true} : vector<8x128xf32> -> vector<8x128xf32>
    %cst_20 = arith.constant 1.06140542 : f32
    %38 = vector.broadcast %cst_20 : f32 to vector<8x128xf32>
    %39 = arith.mulf %38, %37 : vector<8x128xf32>
    %cst_21 = arith.constant -1.45315206 : f32
    %40 = vector.broadcast %cst_21 : f32 to vector<8x128xf32>
    %41 = arith.addf %39, %40 : vector<8x128xf32>
    %42 = arith.mulf %41, %37 : vector<8x128xf32>
    %cst_22 = arith.constant 1.42141378 : f32
    %43 = vector.broadcast %cst_22 : f32 to vector<8x128xf32>
    %44 = arith.addf %42, %43 : vector<8x128xf32>
    %45 = arith.mulf %44, %37 : vector<8x128xf32>
    %cst_23 = arith.constant -0.284496725 : f32
    %46 = vector.broadcast %cst_23 : f32 to vector<8x128xf32>
    %47 = arith.addf %45, %46 : vector<8x128xf32>
    %48 = arith.mulf %47, %37 : vector<8x128xf32>
    %cst_24 = arith.constant 0.254829586 : f32
    %49 = vector.broadcast %cst_24 : f32 to vector<8x128xf32>
    %50 = arith.addf %48, %49 : vector<8x128xf32>
    %51 = arith.mulf %50, %37 : vector<8x128xf32>
    %cst_25 = arith.constant 0.000000e+00 : f32
    %52 = vector.broadcast %cst_25 : f32 to vector<8x128xf32>
    %53 = arith.subf %52, %32 : vector<8x128xf32>
    %54 = arith.mulf %53, %32 : vector<8x128xf32>
    %55 = math.exp %54 : vector<8x128xf32>
    %56 = arith.mulf %51, %55 : vector<8x128xf32>
    %cst_26 = arith.constant 1.000000e+00 : f32
    %57 = vector.broadcast %cst_26 : f32 to vector<8x128xf32>
    %58 = arith.subf %57, %56 : vector<8x128xf32>
    %cst_27 = arith.constant 0.000000e+00 : f32
    %59 = vector.broadcast %cst_27 : f32 to vector<8x128xf32>
    %60 = arith.cmpf olt, %31, %59 : vector<8x128xf32>
    %cst_28 = arith.constant 0.000000e+00 : f32
    %61 = vector.broadcast %cst_28 : f32 to vector<8x128xf32>
    %62 = arith.subf %61, %58 : vector<8x128xf32>
    %63 = arith.select %60, %62, %58 : vector<8x128xi1>, vector<8x128xf32>
    %cst_29 = arith.constant 1.000000e+00 : f32
    %64 = vector.broadcast %cst_29 : f32 to vector<8x128xf32>
    %65 = arith.addf %64, %63 : vector<8x128xf32>
    %66 = arith.mulf %29, %65 : vector<8x128xf32>
    %c1 = arith.constant 1 : index
    %c0_30 = arith.constant 0 : index
    %c0_31 = arith.constant 0 : index
    %67 = vector.load %arg4[%c1, %c0_30, %c0_31] : memref<2x256x256xbf16, #tpu.memory_space<vmem>>, vector<1x256x256xbf16>
    %68 = vector.shape_cast %67 : vector<1x256x256xbf16> to vector<256x256xbf16>
    %69 = arith.truncf %26 : vector<8x128xf32> to vector<8x128xbf16>
    %70 = vector.extract_strided_slice %68 {offsets = [0, 0], sizes = [128, 256], strides = [1, 1]} : vector<256x256xbf16> to vector<128x256xbf16>
    %cst_32 = arith.constant dense<0.000000e+00> : vector<8x256xf32>
    %71 = tpu.matmul %69, %70, %cst_32 {dimension_numbers = #tpu.dot_dimension_numbers<[1], [0], [0], [1], [0, 0, 1, 1], [], []>} : vector<8x128xbf16>, vector<128x256xbf16>, vector<8x256xf32> -> vector<8x256xf32>
    %72 = arith.truncf %66 : vector<8x128xf32> to vector<8x128xbf16>
    %73 = vector.extract_strided_slice %68 {offsets = [128, 0], sizes = [128, 256], strides = [1, 1]} : vector<256x256xbf16> to vector<128x256xbf16>
    %cst_33 = arith.constant dense<0.000000e+00> : vector<8x256xf32>
    %74 = tpu.matmul %72, %73, %cst_33 {dimension_numbers = #tpu.dot_dimension_numbers<[1], [0], [0], [1], [0, 0, 1, 1], [], []>} : vector<8x128xbf16>, vector<128x256xbf16>, vector<8x256xf32> -> vector<8x256xf32>
    %75 = arith.addf %71, %74 : vector<8x256xf32>
    %c1_34 = arith.constant 1 : index
    %c0_35 = arith.constant 0 : index
    %c0_36 = arith.constant 0 : index
    %76 = vector.load %arg5[%c1_34, %c0_35, %c0_36] : memref<2x1x256xf32, #tpu.memory_space<vmem>>, vector<1x1x256xf32>
    %77 = vector.shape_cast %76 : vector<1x1x256xf32> to vector<1x256xf32>
    %78 = vector.broadcast %77 : vector<1x256xf32> to vector<8x256xf32>
    %79 = arith.addf %75, %78 : vector<8x256xf32>
    %80 = vector.extract_strided_slice %79 {offsets = [0, 0], sizes = [8, 128], strides = [1, 1]} : vector<8x256xf32> to vector<8x128xf32>
    %81 = math.sin %80 : vector<8x128xf32>
    %c1_37 = arith.constant 1 : index
    %c0_38 = arith.constant 0 : index
    %c0_39 = arith.constant 0 : index
    %82 = vector.load %arg6[%c1_37, %c0_38, %c0_39] : memref<2x1x128xf32, #tpu.memory_space<vmem>>, vector<1x1x128xf32>
    %83 = vector.shape_cast %82 : vector<1x1x128xf32> to vector<1x128xf32>
    %84 = vector.broadcast %83 : vector<1x128xf32> to vector<8x128xf32>
    %85 = arith.mulf %81, %84 : vector<8x128xf32>
    %86 = vector.extract_strided_slice %79 {offsets = [0, 128], sizes = [8, 128], strides = [1, 1]} : vector<8x256xf32> to vector<8x128xf32>
    %cst_40 = arith.constant 5.000000e-01 : f32
    %87 = vector.broadcast %cst_40 : f32 to vector<8x128xf32>
    %88 = arith.mulf %87, %86 : vector<8x128xf32>
    %cst_41 = arith.constant 0.707106769 : f32
    %89 = vector.broadcast %cst_41 : f32 to vector<8x128xf32>
    %90 = arith.mulf %86, %89 : vector<8x128xf32>
    %91 = math.absf %90 : vector<8x128xf32>
    %cst_42 = arith.constant 0.327591091 : f32
    %92 = vector.broadcast %cst_42 : f32 to vector<8x128xf32>
    %93 = arith.mulf %92, %91 : vector<8x128xf32>
    %cst_43 = arith.constant 1.000000e+00 : f32
    %94 = vector.broadcast %cst_43 : f32 to vector<8x128xf32>
    %95 = arith.addf %94, %93 : vector<8x128xf32>
    %96 = tpu.reciprocal %95 {approx = true} : vector<8x128xf32> -> vector<8x128xf32>
    %cst_44 = arith.constant 1.06140542 : f32
    %97 = vector.broadcast %cst_44 : f32 to vector<8x128xf32>
    %98 = arith.mulf %97, %96 : vector<8x128xf32>
    %cst_45 = arith.constant -1.45315206 : f32
    %99 = vector.broadcast %cst_45 : f32 to vector<8x128xf32>
    %100 = arith.addf %98, %99 : vector<8x128xf32>
    %101 = arith.mulf %100, %96 : vector<8x128xf32>
    %cst_46 = arith.constant 1.42141378 : f32
    %102 = vector.broadcast %cst_46 : f32 to vector<8x128xf32>
    %103 = arith.addf %101, %102 : vector<8x128xf32>
    %104 = arith.mulf %103, %96 : vector<8x128xf32>
    %cst_47 = arith.constant -0.284496725 : f32
    %105 = vector.broadcast %cst_47 : f32 to vector<8x128xf32>
    %106 = arith.addf %104, %105 : vector<8x128xf32>
    %107 = arith.mulf %106, %96 : vector<8x128xf32>
    %cst_48 = arith.constant 0.254829586 : f32
    %108 = vector.broadcast %cst_48 : f32 to vector<8x128xf32>
    %109 = arith.addf %107, %108 : vector<8x128xf32>
    %110 = arith.mulf %109, %96 : vector<8x128xf32>
    %cst_49 = arith.constant 0.000000e+00 : f32
    %111 = vector.broadcast %cst_49 : f32 to vector<8x128xf32>
    %112 = arith.subf %111, %91 : vector<8x128xf32>
    %113 = arith.mulf %112, %91 : vector<8x128xf32>
    %114 = math.exp %113 : vector<8x128xf32>
    %115 = arith.mulf %110, %114 : vector<8x128xf32>
    %cst_50 = arith.constant 1.000000e+00 : f32
    %116 = vector.broadcast %cst_50 : f32 to vector<8x128xf32>
    %117 = arith.subf %116, %115 : vector<8x128xf32>
    %cst_51 = arith.constant 0.000000e+00 : f32
    %118 = vector.broadcast %cst_51 : f32 to vector<8x128xf32>
    %119 = arith.cmpf olt, %90, %118 : vector<8x128xf32>
    %cst_52 = arith.constant 0.000000e+00 : f32
    %120 = vector.broadcast %cst_52 : f32 to vector<8x128xf32>
    %121 = arith.subf %120, %117 : vector<8x128xf32>
    %122 = arith.select %119, %121, %117 : vector<8x128xi1>, vector<8x128xf32>
    %cst_53 = arith.constant 1.000000e+00 : f32
    %123 = vector.broadcast %cst_53 : f32 to vector<8x128xf32>
    %124 = arith.addf %123, %122 : vector<8x128xf32>
    %125 = arith.mulf %88, %124 : vector<8x128xf32>
    %c0_54 = arith.constant 0 : index
    %c0_55 = arith.constant 0 : index
    %126 = vector.load %arg7[%c0_54, %c0_55] : memref<256x128xbf16, #tpu.memory_space<vmem>>, vector<256x128xbf16>
    %127 = arith.truncf %85 : vector<8x128xf32> to vector<8x128xbf16>
    %128 = vector.extract_strided_slice %126 {offsets = [0, 0], sizes = [128, 128], strides = [1, 1]} : vector<256x128xbf16> to vector<128x128xbf16>
    %cst_56 = arith.constant dense<0.000000e+00> : vector<8x128xf32>
    %129 = tpu.matmul %127, %128, %cst_56 {dimension_numbers = #tpu.dot_dimension_numbers<[1], [0], [0], [1], [0, 0, 1, 1], [], []>} : vector<8x128xbf16>, vector<128x128xbf16>, vector<8x128xf32> -> vector<8x128xf32>
    %130 = arith.truncf %125 : vector<8x128xf32> to vector<8x128xbf16>
    %131 = vector.extract_strided_slice %126 {offsets = [128, 0], sizes = [128, 128], strides = [1, 1]} : vector<256x128xbf16> to vector<128x128xbf16>
    %cst_57 = arith.constant dense<0.000000e+00> : vector<8x128xf32>
    %132 = tpu.matmul %130, %131, %cst_57 {dimension_numbers = #tpu.dot_dimension_numbers<[1], [0], [0], [1], [0, 0, 1, 1], [], []>} : vector<8x128xbf16>, vector<128x128xbf16>, vector<8x128xf32> -> vector<8x128xf32>
    %133 = arith.addf %129, %132 : vector<8x128xf32>
    %c0_58 = arith.constant 0 : index
    %c0_59 = arith.constant 0 : index
    %134 = vector.load %arg8[%c0_58, %c0_59] : memref<1x128xf32, #tpu.memory_space<vmem>>, vector<1x128xf32>
    %135 = vector.broadcast %134 : vector<1x128xf32> to vector<8x128xf32>
    %136 = arith.addf %133, %135 : vector<8x128xf32>
    %c0_60 = arith.constant 0 : index
    %c0_61 = arith.constant 0 : index
    %137 = vector.load %arg9[%c0_60, %c0_61] : memref<8x128xf32, #tpu.memory_space<vmem>>, vector<8x128xf32>
    tpu.vector_store %arg9[%c0_60, %c0_61], %136 {strides = array<i32>} : memref<8x128xf32, #tpu.memory_space<vmem>>, vector<8x128xf32>,
    return
  }
  func.func @transform_0(%arg0: i32) -> (i32, i32) {
    %c0_i32 = arith.constant 0 : i32
    %c0_i32_0 = arith.constant 0 : i32
    return %arg0, %c0_i32 : i32, i32
  }
  func.func @transform_1(%arg0: i32) -> (i32, i32) {
    %c0_i32 = arith.constant 0 : i32
    %c0_i32_0 = arith.constant 0 : i32
    %c0_i32_1 = arith.constant 0 : i32
    return %c0_i32, %c0_i32_0 : i32, i32
  }
  func.func @transform_2(%arg0: i32) -> (i32, i32) {
    %c0_i32 = arith.constant 0 : i32
    %c0_i32_0 = arith.constant 0 : i32
    %c0_i32_1 = arith.constant 0 : i32
    return %c0_i32, %c0_i32_0 : i32, i32
  }
  func.func @transform_3(%arg0: i32) -> (i32, i32, i32) {
    %c0_i32 = arith.constant 0 : i32
    %c0_i32_0 = arith.constant 0 : i32
    %c0_i32_1 = arith.constant 0 : i32
    %c0_i32_2 = arith.constant 0 : i32
    return %c0_i32, %c0_i32_0, %c0_i32_1 : i32, i32, i32
  }
  func.func @transform_4(%arg0: i32) -> (i32, i32, i32) {
    %c0_i32 = arith.constant 0 : i32
    %c0_i32_0 = arith.constant 0 : i32
    %c0_i32_1 = arith.constant 0 : i32
    %c0_i32_2 = arith.constant 0 : i32
    return %c0_i32, %c0_i32_0, %c0_i32_1 : i32, i32, i32
  }
  func.func @transform_5(%arg0: i32) -> (i32, i32, i32) {
    %c0_i32 = arith.constant 0 : i32
    %c0_i32_0 = arith.constant 0 : i32
    %c0_i32_1 = arith.constant 0 : i32
    %c0_i32_2 = arith.constant 0 : i32
    return %c0_i32, %c0_i32_0, %c0_i32_1 : i32, i32, i32
  }
  func.func @transform_6(%arg0: i32) -> (i32, i32) {
    %c0_i32 = arith.constant 0 : i32
    %c0_i32_0 = arith.constant 0 : i32
    %c0_i32_1 = arith.constant 0 : i32
    return %c0_i32, %c0_i32_0 : i32, i32
  }
  func.func @transform_7(%arg0: i32) -> (i32, i32) {
    %c0_i32 = arith.constant 0 : i32
    %c0_i32_0 = arith.constant 0 : i32
    %c0_i32_1 = arith.constant 0 : i32
    return %c0_i32, %c0_i32_0 : i32, i32
  }
  func.func @transform_8(%arg0: i32) -> (i32, i32) {
    %c0_i32 = arith.constant 0 : i32
    %c0_i32_0 = arith.constant 0 : i32
    return %arg0, %c0_i32 : i32, i32
  }
}

</mosaic_0001>

<bundles_post_ra>
// kernel: tpu_custom_call.1
= control target key start
LH: loop header
LB: loop body
LE: loop exit
PB: predicated region body
PF: predicated region fallthrough
CT: control target
= control target key end

     0   :  { %13 = vsyncpa [#allocation3], 0  ;;  %s1858_s0 = inlined_call_operand.vmem [shape: f32[8,4], index: 0, kind: input, shape index: {}]   ;;  %s1859_s1 = inlined_call_operand.vmem [shape: f32[4,256], index: 1, kind: input, shape index: {}]   ;;  %s1860_s2 = inlined_call_operand.vmem [shape: f32[1,256], index: 2, kind: input, shape index: {}]   ;;  %s1861_s3 = inlined_call_operand.hbm [shape: bf16[2,256,256], index: 3, kind: input, shape index: {}]   ;;  %s1862_s4 = inlined_call_operand.vmem [shape: f32[2,1,256], index: 4, kind: input, shape index: {}]   ;;  %s1863_s5 = inlined_call_operand.vmem [shape: f32[2,1,128], index: 5, kind: input, shape index: {}]   ;;  %s1864_s6 = inlined_call_operand.hbm [shape: bf16[256,128], index: 6, kind: input, shape index: {}]   ;;  %s1865_s7 = inlined_call_operand.vmem [shape: f32[1,128], index: 7, kind: input, shape index: {}]   ;;  %s1866_s8 = inlined_call_operand.hbm [shape: f32[8,128], index: 8, kind: output, shape index: {}]  }
   0x1   :  { %14 = vsyncpa [#allocation6], 0 }
   0x2   :  { %15 = vsyncpa [#allocation4], 0  ;;  %s1628_s27 = smov [#allocation2]   ;;  %s1556_s9 = scalar_lea.hbm %s1861_s3, 8192 }
   0x3   :  { %s27_s28 = sshll.u32 %s1628_s27, 4  ;;  %p1557_p0 = scmp.ne.s32.totalorder %s1861_s3, %s1556_s9  ;;  %s28_s28 = int_to_ptr.vmem [resolvable:$true] %s27_s28 }
   0x4   :  { %p1560_p1 = scmp.lt.u32.totalorder %s1556_s9, %s1861_s3 }
   0x6   :  { %p1562_p2 = pnand %p1560_p1, %p1557_p0 }
   0x8   :  { %1565 = shalt.err (!%p1562_p2)
}
   0x9   :  { %s1566_s14 = scalar_lea.vmem %s28_s28, 8192  ;;  %p1571_p4 = scmp.lt.s32.totalorder %s28_s28, %s28_s28 }
   0xa   :  { %p1567_p3 = scmp.ne.s32.totalorder %s28_s28, %s1566_s14  ;;  %p1572_p5 = scmp.lt.s32.totalorder %s1566_s14, %s1566_s14 }
   0xc   :  { %p1573_p6 = por %p1572_p5, %p1571_p4 }
   0xe   :  { %p1574_p7 = pnand %p1573_p6, %p1567_p3 }
  0x10   :  { %1577 = shalt.err (!%p1574_p7)
}
  0x11   :  { %s1629_s15 = smov 128   ;;  %s1630_s16 = smov 8  }
  0x12   :  { %33 = dma.hbm_to_vmem [thread:$0]  %s1861_s3, 8192, %s28_s28, [#allocation3], %s1629_s15, %s1629_s15, %s1630_s16  }
  0x13   :  { %s1631_s19 = smov [#allocation5]   ;;  %s1578_s23 = scalar_lea.hbm %s1864_s6, 2048 }
  0x14   :  { %s43_s20 = sshll.u32 %s1631_s19, 4  ;;  %p1579_p8 = scmp.ne.s32.totalorder %s1864_s6, %s1578_s23  ;;  %s44_s20 = int_to_ptr.vmem [resolvable:$true] %s43_s20 }
  0x15   :  { %p1582_p9 = scmp.lt.u32.totalorder %s1578_s23, %s1864_s6 }
  0x17   :  { %p1584_p10 = pnand %p1582_p9, %p1579_p8 }
  0x19   :  { %1587 = shalt.err (!%p1584_p10)
}
  0x1a   :  { %s1588_s29 = scalar_lea.vmem %s44_s20, 2048  ;;  %p1593_p12 = scmp.lt.s32.totalorder %s44_s20, %s44_s20 }
  0x1b   :  { %p1589_p11 = scmp.ne.s32.totalorder %s44_s20, %s1588_s29  ;;  %p1594_p13 = scmp.lt.s32.totalorder %s1588_s29, %s1588_s29 }
  0x1d   :  { %p1595_p0 = por %p1594_p13, %p1593_p12 }
  0x1f   :  { %p1596_p1 = pnand %p1595_p0, %p1589_p11 }
  0x21   :  { %1599 = shalt.err (!%p1596_p1)
}
  0x22   :  { %s1632_s3 = smov 64   ;;  %s1633_s28 = smov 4  }
  0x23   :  { %49 = dma.hbm_to_vmem [thread:$0]  %s1864_s6, 2048, %s44_s20, [#allocation6], %s1632_s3, %s1632_s3, %s1633_s28  }
  0x24   :  { %1622 = dma.done.wait [#allocation3], 8192  }
  0x25   :  { %1623 = vsyncadd [#allocation3], 4294959104 }
  0x26   :  { %1624 = dma.done.wait [#allocation6], 2048  }
  0x27   :  { %1625 = vsyncadd [#allocation6], 4294965248  ;;  %v1634_v0 = vmov 0.0   ;;  %v60_v1 = vld [vmem:[%s1859_s1] sm:$0xff]  ;;  %vm79_vm0 = vcmask 1043456   ;;  %vm75_vm1 = vcmask 31744   ;;  %v63_v37 = vlaneseq }
  0x28   :  { %148 = vmatprep.mubr.f32.mxu0 %v1634_v0  ;;  %v59_v2 = vld [vmem:[%s1858_s0] sm:$0xff]  ;;  %v74_v3 = vcombine.high %v60_v1, %v60_v1  ;;  %v1428_v4 = vld [vmem:[#allocation2] ss:$8 sps:$4 sm:$0xff]   ;;  %v1430_v5 = vld [vmem:[#allocation2 + $0x4] ss:$8 sps:$4 sm:$0xff]   ;;  %v1635_v36 = vmov 0  }
  0x29   :  { %v1431_v6 = vld [vmem:[#allocation2 + $0x84] ss:$8 sps:$4 sm:$0xff]   ;;  %v1433_v7 = vld [vmem:[#allocation2 + $0x80] ss:$8 sps:$4 sm:$0xff]   ;;  %v1436_v8 = vld [vmem:[#allocation2 + $0x14] ss:$8 sps:$4 sm:$0xff]   ;;  %301 = vmatprep.mubr.bf16.mxu1 %v1635_v36 }
  0x2a   :  { %1249 = vmatprep.subr.msk.mxu0 %vm79_vm0, %v74_v3  ;;  %269 = vmatprep.subr.bf16.mxu1 %v1431_v6  ;;  %v1434_v9 = vld [vmem:[#allocation2 + $0x10] ss:$8 sps:$4 sm:$0xff]   ;;  %v1437_v10 = vld [vmem:[#allocation2 + $0x94] ss:$8 sps:$4 sm:$0xff]   ;;  %v1442_v12 = vld [vmem:[#allocation2 + $0x24] ss:$8 sps:$4 sm:$0xff]  }
  0x2b   :  { %1250 = vmatpush1.msk.msra.mxu0 %vm79_vm0, %v60_v1  ;;  %270 = vmatpush1.bf16.msra.mxu1 %v1433_v7  ;;  %v1439_v11 = vld [vmem:[#allocation2 + $0x90] ss:$8 sps:$4 sm:$0xff]   ;;  %v1443_v13 = vld [vmem:[#allocation2 + $0xa4] ss:$8 sps:$4 sm:$0xff]   ;;  %v1440_v14 = vld [vmem:[#allocation2 + $0x20] ss:$8 sps:$4 sm:$0xff]  }
  0x2c   :  { %1251 = vmatmul.mubr.msk.f32.vlgmr.msra.gmra.mrb[0].mxu0 %vm75_vm1, %v59_v2  ;;  %390 = vmatprep.subr.bf16.mxu0 %v1430_v5  ;;  %v1445_v15 = vld [vmem:[#allocation2 + $0xa0] ss:$8 sps:$4 sm:$0xff]   ;;  %v1448_v16 = vld [vmem:[#allocation2 + $0x34] ss:$8 sps:$4 sm:$0xff]   ;;  %v1446_v18 = vld [vmem:[#allocation2 + $0x30] ss:$8 sps:$4 sm:$0xff]  }
  0x2d   :  { %391 = vmatpush1.bf16.msra.mxu0 %v1428_v4  ;;  %271 = vmatprep.subr.bf16.mxu1 %v1437_v10  ;;  %v1449_v17 = vld [vmem:[#allocation2 + $0xb4] ss:$8 sps:$4 sm:$0xff]   ;;  %v1451_v19 = vld [vmem:[#allocation2 + $0xb0] ss:$8 sps:$4 sm:$0xff]   ;;  %v1454_v20 = vld [vmem:[#allocation2 + $0x44] ss:$8 sps:$4 sm:$0xff]  }
  0x2e   :  { %392 = vmatprep.subr.bf16.mxu0 %v1436_v8  ;;  %v1455_v21 = vld [vmem:[#allocation2 + $0xc4] ss:$8 sps:$4 sm:$0xff]   ;;  %v1452_v22 = vld [vmem:[#allocation2 + $0x40] ss:$8 sps:$4 sm:$0xff]   ;;  %v1460_v24 = vld [vmem:[#allocation2 + $0x54] ss:$8 sps:$4 sm:$0xff]   ;;  %422 = vmatprep.mubr.bf16.mxu0 %v1635_v36 }
  0x2f   :  { %272 = vmatpush1.bf16.msra.mxu1 %v1439_v11  ;;  %v1457_v23 = vld [vmem:[#allocation2 + $0xc0] ss:$8 sps:$4 sm:$0xff]   ;;  %v1461_v25 = vld [vmem:[#allocation2 + $0xd4] ss:$8 sps:$4 sm:$0xff]   ;;  %v1458_v26 = vld [vmem:[#allocation2 + $0x50] ss:$8 sps:$4 sm:$0xff]  }
  0x30   :  { %273 = vmatprep.subr.bf16.mxu1 %v1443_v13  ;;  %v1463_v27 = vld [vmem:[#allocation2 + $0xd0] ss:$8 sps:$4 sm:$0xff]   ;;  %v1466_v28 = vld [vmem:[#allocation2 + $0x64] ss:$8 sps:$4 sm:$0xff]   ;;  %v1464_v30 = vld [vmem:[#allocation2 + $0x60] ss:$8 sps:$4 sm:$0xff]  }
  0x31   :  { %393 = vmatpush1.bf16.msra.mxu0 %v1434_v9  ;;  %v1467_v29 = vld [vmem:[#allocation2 + $0xe4] ss:$8 sps:$4 sm:$0xff]   ;;  %v1469_v31 = vld [vmem:[#allocation2 + $0xe0] ss:$8 sps:$4 sm:$0xff]   ;;  %v1472_v32 = vld [vmem:[#allocation2 + $0x74] ss:$8 sps:$4 sm:$0xff]  }
  0x32   :  { %394 = vmatprep.subr.bf16.mxu0 %v1442_v12  ;;  %v1470_v33 = vld [vmem:[#allocation2 + $0x70] ss:$8 sps:$4 sm:$0xff]   ;;  %v1473_v34 = vld [vmem:[#allocation2 + $0xf4] ss:$8 sps:$4 sm:$0xff]   ;;  %v64_v38 = vshrl.u32 %v63_v37, 7  ;;  %vm1642_vm0 = vmmov 0  }
  0x33   :  { %274 = vmatpush1.bf16.msra.mxu1 %v1445_v15  ;;  %v1475_v35 = vld [vmem:[#allocation2 + $0xf0] ss:$8 sps:$4 sm:$0xff]   ;;  %v1478_v50 = vld [vmem:[#allocation2 + $0x184] ss:$8 sps:$4 sm:$0xff]   ;;  %v1476_v51 = vld [vmem:[#allocation2 + $0x180] ss:$8 sps:$4 sm:$0xff]  }
  0x34   :  { %275 = vmatprep.subr.bf16.mxu1 %v1449_v17  ;;  %v1720_v39 = vsub.s32 0, %v64_v38  ;;  %v61_v40 = vld [vmem:[%s1860_s2] sm:$0x3]  ;;  %v1725_v41 = vsub.s32 1, %v64_v38  ;;  %v1481_v52 = vld [vmem:[#allocation2 + $0x194] ss:$8 sps:$4 sm:$0xff]  }
  0x35   :  { %395 = vmatpush1.bf16.msra.mxu0 %v1440_v14  ;;  %v1479_v53 = vld [vmem:[#allocation2 + $0x190] ss:$8 sps:$4 sm:$0xff]   ;;  %v1484_v54 = vld [vmem:[#allocation2 + $0x1a4] ss:$8 sps:$4 sm:$0xff]   ;;  %v1482_v55 = vld [vmem:[#allocation2 + $0x1a0] ss:$8 sps:$4 sm:$0xff]  }
  0x36   :  { %396 = vmatprep.subr.bf16.mxu0 %v1448_v16  ;;  %v66_v42 = vrot.slane %v61_v40, %v1720_v39  ;;  %v70_v43 = vrot.slane %v61_v40, %v1725_v41  ;;  %v1487_v56 = vld [vmem:[#allocation2 + $0x1b4] ss:$8 sps:$4 sm:$0xff]   ;;  %v1485_v57 = vld [vmem:[#allocation2 + $0x1b0] ss:$8 sps:$4 sm:$0xff]   ;;  %v1490_v58 = vld [vmem:[#allocation2 + $0x1c4] ss:$8 sps:$4 sm:$0xff]  }
  0x37   :  { %276 = vmatpush1.bf16.msra.mxu1 %v1451_v19  ;;  %v1488_v59 = vld [vmem:[#allocation2 + $0x1c0] ss:$8 sps:$4 sm:$0xff]   ;;  %v1493_v60 = vld [vmem:[#allocation2 + $0x1d4] ss:$8 sps:$4 sm:$0xff]   ;;  %v1491_v61 = vld [vmem:[#allocation2 + $0x1d0] ss:$8 sps:$4 sm:$0xff]  }
  0x38   :  { %277 = vmatprep.subr.bf16.mxu1 %v1455_v21  ;;  %v1496_v62 = vld [vmem:[#allocation2 + $0x1e4] ss:$8 sps:$4 sm:$0xff]   ;;  %v1494_v63 = vld [vmem:[#allocation2 + $0x1e0] ss:$8 sps:$4 sm:$0xff]   ;;  %v1499_v1 = vld [vmem:[#allocation2 + $0x1f4] ss:$8 sps:$4 sm:$0xff]  }
  0x39   :  { %397 = vmatpush1.bf16.msra.mxu0 %v1446_v18  ;;  %v1497_v2 = vld [vmem:[#allocation2 + $0x1f0] ss:$8 sps:$4 sm:$0xff]   ;;  %v1502_v3 = vld [vmem:[#allocation2 + $0x104] ss:$8 sps:$4 sm:$0xff]   ;;  %v1500_v4 = vld [vmem:[#allocation2 + $0x100] ss:$8 sps:$4 sm:$0xff]  }
  0x3a   :  { %398 = vmatprep.subr.bf16.mxu0 %v1454_v20  ;;  %v1505_v5 = vld [vmem:[#allocation2 + $0x114] ss:$8 sps:$4 sm:$0xff]   ;;  %v1503_v6 = vld [vmem:[#allocation2 + $0x110] ss:$8 sps:$4 sm:$0xff]   ;;  %v1508_v7 = vld [vmem:[#allocation2 + $0x124] ss:$8 sps:$4 sm:$0xff]  }
  0x3b   :  { %278 = vmatpush1.bf16.msra.mxu1 %v1457_v23  ;;  %v1506_v8 = vld [vmem:[#allocation2 + $0x120] ss:$8 sps:$4 sm:$0xff]   ;;  %v1511_v9 = vld [vmem:[#allocation2 + $0x134] ss:$8 sps:$4 sm:$0xff]   ;;  %v1509_v10 = vld [vmem:[#allocation2 + $0x130] ss:$8 sps:$4 sm:$0xff]  }
  0x3c   :  { %279 = vmatprep.subr.bf16.mxu1 %v1461_v25  ;;  %v1514_v11 = vld [vmem:[#allocation2 + $0x144] ss:$8 sps:$4 sm:$0xff]   ;;  %v1512_v12 = vld [vmem:[#allocation2 + $0x140] ss:$8 sps:$4 sm:$0xff]   ;;  %v1517_v13 = vld [vmem:[#allocation2 + $0x154] ss:$8 sps:$4 sm:$0xff]  }
  0x3d   :  { %399 = vmatpush1.bf16.msra.mxu0 %v1452_v22  ;;  %v1515_v14 = vld [vmem:[#allocation2 + $0x150] ss:$8 sps:$4 sm:$0xff]   ;;  %v1520_v15 = vld [vmem:[#allocation2 + $0x164] ss:$8 sps:$4 sm:$0xff]   ;;  %v1518_v16 = vld [vmem:[#allocation2 + $0x160] ss:$8 sps:$4 sm:$0xff]  }
  0x3e   :  { %400 = vmatprep.subr.bf16.mxu0 %v1460_v24  ;;  %v1523_v17 = vld [vmem:[#allocation2 + $0x174] ss:$8 sps:$4 sm:$0xff]   ;;  %v1521_v18 = vld [vmem:[#allocation2 + $0x170] ss:$8 sps:$4 sm:$0xff]   ;;  %s1643_s21 = smov [#allocation7]  }
  0x3f   :  { %280 = vmatpush1.bf16.msra.mxu1 %v1463_v27  ;;  %v431_v19 = vld [vmem:[%s1862_s4] sm:$0x3]  ;;  %s1239_s22 = sshll.u32 %s1643_s21, 4  ;;  %s1240_s22 = int_to_ptr.vmem [resolvable:$true] %s1239_s22 }
  0x40   :  { %281 = vmatprep.subr.bf16.mxu1 %v1467_v29  ;;  %v436_v21 = vrot.slane %v431_v19, %v1720_v39  ;;  %v440_v24 = vrot.slane %v431_v19, %v1725_v41  ;;  %p1605_p3 = scmp.lt.s32.totalorder %s1240_s22, %s1240_s22 }
  0x41   :  { %401 = vmatpush1.bf16.msra.mxu0 %v1458_v26 }
  0x42   :  { %402 = vmatprep.subr.bf16.mxu0 %v1466_v28 }
  0x43   :  { %282 = vmatpush1.bf16.msra.mxu1 %v1469_v31 }
  0x44   :  { %283 = vmatprep.subr.bf16.mxu1 %v1473_v34 }
  0x45   :  { %403 = vmatpush1.bf16.msra.mxu0 %v1464_v30 }
  0x46   :  { %404 = vmatprep.subr.bf16.mxu0 %v1472_v32 }
  0x47   :  { %284 = vmatpush1.bf16.msra.mxu1 %v1475_v35 }
  0x48   :  { %698 = vmatprep.subr.bf16.mxu1 %v1478_v50 }
  0x49   :  { %405 = vmatpush1.bf16.msra.mxu0 %v1470_v33 }
  0x4a   :  { %819 = vmatprep.subr.bf16.mxu0 %v1502_v3  ;;  %v1641_v3 = vmov 1326507024  }
  0xff   :  { %v150_v44 = vpop.f32.mrb[0].mxu0 }
 0x100   :  { %v151_v45 = vadd.f32 %v150_v44, %v66_v42  ;;  %v152_v46 = vpop.f32.mrb[1].mxu0 }
 0x101   :  { %v153_v47 = vadd.f32 %v152_v46, %v70_v43 }
 0x102   :  { %v187_v48 = vpack.c.bf16 %v151_v45, %v151_v45 }
 0x103   :  { %v188_v49 = vpack.c.bf16 %v153_v47, %v153_v47 }
 0x104   :  { %423 = vmatmul.mubr.bf16.vlgmr.msra.gmra.mrb[4].mxu0 %v187_v48 }
 0x105   :  { %302 = vmatmul.mubr.bf16.vlgmr.msra.gmra.mrb[0].mxu1 %v188_v49  ;;  %851 = vmatprep.mubr.bf16.mxu0 %v1635_v36 }
 0x106   :  { %730 = vmatprep.mubr.bf16.mxu1 %v1635_v36  ;;  %699 = vmatpush1.bf16.msra.mxu1 %v1476_v51  ;;  %v1636_v51 = vmov 683565275  }
 0x107   :  { %700 = vmatprep.subr.bf16.mxu1 %v1481_v52  ;;  %820 = vmatpush1.bf16.msra.mxu0 %v1500_v4 }
 0x108   :  { %821 = vmatprep.subr.bf16.mxu0 %v1505_v5 }
 0x10a   :  { %701 = vmatpush1.bf16.msra.mxu1 %v1479_v53  ;;  %v1637_v53 = vmov 2475754826  }
 0x10b   :  { %702 = vmatprep.subr.bf16.mxu1 %v1484_v54  ;;  %822 = vmatpush1.bf16.msra.mxu0 %v1503_v6 }
 0x10c   :  { %823 = vmatprep.subr.bf16.mxu0 %v1508_v7 }
 0x10e   :  { %703 = vmatpush1.bf16.msra.mxu1 %v1482_v55 }
 0x10f   :  { %704 = vmatprep.subr.bf16.mxu1 %v1487_v56  ;;  %824 = vmatpush1.bf16.msra.mxu0 %v1506_v8 }
 0x110   :  { %825 = vmatprep.subr.bf16.mxu0 %v1511_v9 }
 0x112   :  { %705 = vmatpush1.bf16.msra.mxu1 %v1485_v57  ;;  %v1638_v57 = vmov 2131351028  }
 0x113   :  { %706 = vmatprep.subr.bf16.mxu1 %v1490_v58  ;;  %826 = vmatpush1.bf16.msra.mxu0 %v1509_v10 }
 0x114   :  { %827 = vmatprep.subr.bf16.mxu0 %v1514_v11 }
 0x116   :  { %707 = vmatpush1.bf16.msra.mxu1 %v1488_v59 }
 0x117   :  { %708 = vmatprep.subr.bf16.mxu1 %v1493_v60  ;;  %828 = vmatpush1.bf16.msra.mxu0 %v1512_v12  ;;  %v1639_v60 = vmov 2102212464  }
 0x118   :  { %829 = vmatprep.subr.bf16.mxu0 %v1517_v13 }
 0x11a   :  { %709 = vmatpush1.bf16.msra.mxu1 %v1491_v61 }
 0x11b   :  { %710 = vmatprep.subr.bf16.mxu1 %v1496_v62  ;;  %830 = vmatpush1.bf16.msra.mxu0 %v1515_v14 }
 0x11c   :  { %831 = vmatprep.subr.bf16.mxu0 %v1520_v15 }
 0x11e   :  { %711 = vmatpush1.bf16.msra.mxu1 %v1494_v63  ;;  %v1640_v63 = vmov 920167782  }
 0x11f   :  { %712 = vmatprep.subr.bf16.mxu1 %v1499_v1  ;;  %832 = vmatpush1.bf16.msra.mxu0 %v1518_v16 }
 0x120   :  { %833 = vmatprep.subr.bf16.mxu0 %v1523_v17 }
 0x122   :  { %713 = vmatpush1.bf16.msra.mxu1 %v1497_v2 }
 0x123   :  { %1363 = vmatprep.subr.bf16.mxu1 %v1634_v0  ;;  %834 = vmatpush1.bf16.msra.mxu0 %v1521_v18 }
 0x124   :  { %1383 = vmatprep.subr.bf16.mxu0 %v1634_v0 }
 0x1d7   :  { %v424_v20 = vpop.f32.mrb[4].mxu0 }
 0x1d8   :  { %v303_v22 = vpop.f32.mrb[0].mxu1  ;;  %v426_v23 = vpop.f32.mrb[5].mxu0 }
 0x1d9   :  { %v425_v25 = vadd.f32 %v424_v20, %v303_v22  ;;  %v305_v26 = vpop.f32.mrb[1].mxu1  ;;  %v428_v27 = vpop.f32.mrb[6].mxu0 }
 0x1da   :  { %v427_v28 = vadd.f32 %v426_v23, %v305_v26  ;;  %v307_v29 = vpop.f32.mrb[2].mxu1  ;;  %v429_v30 = vpop.f32.mrb[7].mxu0 }
 0x1db   :  { %v1736_v31 = vadd.f32 %v436_v21, %v425_v25  ;;  %v308_v32 = vpop.f32.mrb[3].mxu1 }
 0x1dc   :  { %v1738_v33 = vadd.f32 %v440_v24, %v427_v28 }
 0x1dd   :  { %v448_v34 = vand.u32 2139095040, %v1736_v31  ;;  %v445_v38 = vand.u32 2147483647, %v1736_v31  ;;  %vm447_vm10 = vcmp.lt.s32.totalorder %v1736_v31, 0  ;;  %vm537_vm15 = vweird.f32 %v1736_v31 }
 0x1de   :  { %v1742_v35 = vmul.f32 0.70710677, %v1738_v33 }
 0x1df   :  { %v449_v36 = vshrl.u32 %v448_v34, 23  ;;  %v452_v45 = vand.u32 8388607, %v445_v38  ;;  %vm446_vm11 = vcmp.le.f32.partialorder %v445_v38, 0.7853982 }
 0x1e0   :  { %v559_v37 = vand.u32 2147483647, %v1742_v35  ;;  %vm578_vm8 = vcmp.lt.f32.partialorder %v1742_v35, 0.0  ;;  %v1288_v38 = vld [vmem:[%s1863_s5] ss:$0 sm:$0xff] }
 0x1e1   :  { %v1284_v40 = vadd.s32 4294967169, %v449_v36  ;;  %v453_v48 = vor.u32 8388608, %v452_v45 }
 0x1e2   :  { %v560_v42 = vmul.f32 0.3275911, %v559_v37  ;;  %v572_v55 = vsub.f32 0.0, %v559_v37 }
 0x1e3   :  { %v455_v43 = vadd.s32 1, %v1284_v40  ;;  %v493_v8 = vshll.u32 %v453_v48, 8 }
 0x1e4   :  { %v561_v44 = vadd.f32 1.0, %v560_v42  ;;  %v573_v14 = vmul.f32 %v572_v55, %v559_v37 }
 0x1e5   :  { %vm456_vm2 = vcmp.gt.s32.totalorder %v455_v43, 0 }
 0x1e6   :  { %v457_v46 = vsel %vm456_vm2, %v455_v43, 0  ;;  %1540 = vrcp.f32 %v561_v44  ;;  %v574_v34 = vmul.f32 1.442695, %v573_v14 }
 0x1e7   :  { %v459_v47 = vand.u32 31, %v457_v46  ;;  %v458_v50 = vshrl.u32 %v457_v46, 5 }
 0x1e8   :  { %1542 = vpow2.f32 %v574_v34 }
 0x1e9   :  { %v460_v49 = vsub.s32 32, %v459_v47  ;;  %v462_v52 = vshll.u32 %v1636_v51, %v459_v47  ;;  %v465_v54 = vshll.u32 %v1637_v53, %v459_v47  ;;  %v468_v59 = vshll.u32 %v1638_v57, %v459_v47 }
 0x1ea   :  { %v471_v62 = vshll.u32 %v1639_v60, %v459_v47  ;;  %v474_v2 = vshll.u32 %v1640_v63, %v459_v47  ;;  %vm477_vm3 = vcmp.lt.s32.totalorder %v458_v50, 1  ;;  %vm480_vm4 = vcmp.lt.s32.totalorder %v458_v50, 4 }
 0x1eb   :  { %v463_v56 = vshrl.u32 %v1637_v53, %v460_v49  ;;  %v466_v58 = vshrl.u32 %v1638_v57, %v460_v49  ;;  %v469_v61 = vshrl.u32 %v1639_v60, %v460_v49  ;;  %v472_v1 = vshrl.u32 %v1640_v63, %v460_v49 }
 0x1ec   :  { %v475_v4 = vshrl.u32 %v1641_v3, %v460_v49  ;;  %v461_v16 = vshrl.u32 %v1636_v51, %v460_v49  ;;  %vm479_vm5 = vcmp.lt.s32.totalorder %v458_v50, 3  ;;  %vm478_vm6 = vcmp.lt.s32.totalorder %v458_v50, 2 }
 0x1ed   :  { %v464_v5 = vor.u32 %v463_v56, %v462_v52  ;;  %v467_v6 = vor.u32 %v466_v58, %v465_v54  ;;  %v470_v7 = vor.u32 %v469_v61, %v468_v59  ;;  %v473_v9 = vor.u32 %v472_v1, %v471_v62 }
 0x1ee   :  { %v476_v10 = vor.u32 %v475_v4, %v474_v2 }
 0x1ef   :  { %v482_v11 = vsel %vm480_vm4, %v470_v7, 2102212464  ;;  %v485_v12 = vsel %vm477_vm3, %v464_v5, %v467_v6  ;;  %v489_v13 = vsel %vm477_vm3, %v467_v6, %v470_v7  ;;  %v486_v17 = vsel %vm480_vm4, %v473_v9, 920167782 }
 0x1f0   :  { %v1541_v15 = vpop.eup %1540  ;;  %v490_v18 = vsel %vm480_vm4, %v476_v10, 1326507024  ;;  %v487_v19 = vsel %vm479_vm5, %v470_v7, %v486_v17  ;;  %v481_v22 = vsel %vm477_vm3, %v461_v16, %v464_v5  ;;  %v483_v23 = vsel %vm479_vm5, %v467_v6, %v482_v11 }
 0x1f1   :  { %v491_v20 = vsel %vm479_vm5, %v473_v9, %v490_v18  ;;  %v563_v21 = vmul.f32 1.0614054, %v1541_v15  ;;  %v488_v24 = vsel %vm478_vm6, %v485_v12, %v487_v19  ;;  %v484_v32 = vsel %vm478_vm6, %v481_v22, %v483_v23 }
 0x1f2   :  { %v492_v25 = vsel %vm478_vm6, %v489_v13, %v491_v20  ;;  %v1762_v28 = vmul.u32.u64.low %v493_v8, %v488_v24  ;;  %v1763_v29 = vmul.u32.u64.high %v493_v8, %v488_v24, %v1762_v28  ;;  %v500_v40 = vmul.u32 %v493_v8, %v484_v32  ;;  %v1543_v56 = vpop.eup %1542 }
 0x1f3   :  { %v1759_v26 = vmul.u32.u64.low %v493_v8, %v492_v25  ;;  %v1760_v27 = vmul.u32.u64.high %v493_v8, %v492_v25, %v1759_v26  ;;  %v564_v30 = vadd.f32 -1.4531521, %v563_v21  ;;  %v557_v6 = vmul.f32 0.5, %v1738_v33 }
 0x1f4   :  { %v503_v37 = vadd.s32 1, %v1763_v29 }
 0x1f5   :  { %v565_v36 = vmul.f32 %v1541_v15, %v564_v30  ;;  %vm502_vm7 = vc.u32 %v1760_v27, %v1762_v28  ;;  %v501_v10 = vadd.s32 %v1762_v28, %v1760_v27 }
 0x1f6   :  { %v504_v43 = vsel %vm502_vm7, %v503_v37, %v1763_v29 }
 0x1f7   :  { %v566_v42 = vadd.f32 1.4214138, %v565_v36  ;;  %v505_v44 = vadd.s32 %v504_v43, %v500_v40 }
 0x1f9   :  { %v567_v45 = vmul.f32 %v1541_v15, %v566_v42  ;;  %v506_v46 = vadd.s32 536870912, %v505_v44 }
 0x1fb   :  { %v568_v47 = vadd.f32 -0.28449672, %v567_v45  ;;  %v507_v48 = vshrl.u32 %v506_v46, 30  ;;  %v1524_v45 = vld [vmem:[#allocation5 + $0x40] sm:$0xff]   ;;  %v1525_v46 = vld [vmem:[#allocation5 + $0x48] sm:$0xff]  }
 0x1fd   :  { %v569_v49 = vmul.f32 %v1541_v15, %v568_v47  ;;  %v508_v50 = vshll.u32 %v507_v48, 30  ;;  %v531_v33 = vsub.s32 4, %v507_v48  ;;  %v1526_v47 = vld [vmem:[#allocation5 + $0x50] sm:$0xff]  }
 0x1ff   :  { %v570_v52 = vadd.f32 0.2548296, %v569_v49  ;;  %v509_v54 = vsub.s32 %v505_v44, %v508_v50  ;;  %v532_v24 = vsel %vm447_vm10, %v531_v33, %v507_v48  ;;  %v1527_v48 = vld [vmem:[#allocation5 + $0x58] sm:$0xff]   ;;  %v1529_v49 = vld [vmem:[#allocation5 + $0x68] sm:$0xff]   ;;  %v1530_v50 = vld [vmem:[#allocation5 + $0x70] sm:$0xff]  }
 0x200   :  { %v534_v26 = vsel %vm446_vm11, 0, %v532_v24 }
 0x201   :  { %v571_v55 = vmul.f32 %v1541_v15, %v570_v52  ;;  %v511_v58 = vsub.s32 0, %v509_v54  ;;  %v538_v27 = vadd.s32 3, %v534_v26  ;;  %v1531_v52 = vld [vmem:[#allocation5 + $0x78] sm:$0xff]  }
 0x203   :  { %v576_v59 = vmul.f32 %v1543_v56, %v571_v55  ;;  %v1285_v61 = vmin.u32 %v511_v58, %v509_v54  ;;  %v539_v28 = vand.u32 3, %v538_v27  ;;  %v1533_v55 = vld [vmem:[#allocation5 + $0x8] sm:$0xff]   ;;  %v1534_v56 = vld [vmem:[#allocation5 + $0x10] sm:$0xff]   ;;  %v1535_v58 = vld [vmem:[#allocation5 + $0x18] sm:$0xff]  }
 0x205   :  { %v577_v62 = vsub.f32 1.0, %v576_v59  ;;  %v513_v1 = vclz %v1285_v61  ;;  %vm544_vm12 = vcmp.eq.s32.totalorder %v539_v28, 2  ;;  %vm541_vm13 = vcmp.eq.s32.totalorder %v539_v28, 0  ;;  %v1536_v59 = vld [vmem:[#allocation5 + $0x20] sm:$0xff]   ;;  %v1537_v61 = vld [vmem:[#allocation5 + $0x28] sm:$0xff]  }
 0x206   :  { %vm540_vm14 = vcmp.lt.s32.totalorder %v539_v28, 2 }
 0x207   :  { %v579_v2 = vsub.f32 0.0, %v577_v62  ;;  %v1286_v4 = vadd.s32 4294967294, %v513_v1  ;;  %v1539_v1 = vld [vmem:[#allocation5 + $0x38] sm:$0xff]  }
 0x209   :  { %v580_v5 = vsel %vm578_vm8, %v579_v2, %v577_v62  ;;  %vm1287_vm9 = vcmp.lt.s32.totalorder %v1286_v4, 0  ;;  %v1538_v62 = vld [vmem:[#allocation5 + $0x30] sm:$0xff]  }
 0x20a   :  { %v581_v7 = vadd.f32 1.0, %v580_v5  ;;  %v516_v8 = vsel %vm1287_vm9, 0, %v1286_v4 }
 0x20b   :  { %v517_v11 = vsub.s32 32, %v516_v8  ;;  %v521_v12 = vsub.s32 4294967266, %v516_v8  ;;  %v518_v14 = vshll.u32 %v509_v54, %v516_v8  ;;  %v1532_v54 = vld [vmem:[#allocation5] sm:$0xff]  }
 0x20c   :  { %v582_v9 = vmul.f32 %v581_v7, %v557_v6  ;;  %v1321_v7 = vld [vmem:[%s1862_s4 + $0x2] sm:$0x3] }
 0x20d   :  { %v519_v15 = vshrl.u32 %v501_v10, %v517_v11  ;;  %v522_v16 = vadd.s32 127, %v521_v12  ;;  %v866_v8 = vrot.slane %v1321_v7, %v1720_v39  ;;  %v870_v10 = vrot.slane %v1321_v7, %v1725_v41 }
 0x20e   :  { %v617_v13 = vpack.c.bf16 %v582_v9, %v582_v9 }
 0x20f   :  { %v520_v17 = vor.u32 %v519_v15, %v518_v14  ;;  %v523_v18 = vshll.u32 %v522_v16, 23 }
 0x210   :  { %731 = vmatmul.mubr.bf16.vlgmr.msra.gmra.mrb[4].mxu1 %v617_v13 }
 0x211   :  { %v524_v35 = vor.u32 4788187, %v523_v18  ;;  %v527_v20 = vcvt.s32.f32 %v520_v17  ;;  %1364 = vmatpush3.bf16.msra.mxu1 %v1524_v45  ;;  %1379 = vmatprep.mubr.msk.bf16.mxu1 %vm1642_vm0, %v1634_v0 }
 0x212   :  { %1365 = vmatprep.subr.bf16.mxu1 %v1634_v0 }
 0x213   :  { %v525_v19 = vand.u32 2147483647, %v524_v35 }
 0x215   :  { %v528_v21 = vmul.f32 %v527_v20, %v525_v19  ;;  %1366 = vmatpush3.bf16.msra.mxu1 %v1525_v46 }
 0x216   :  { %1367 = vmatprep.subr.bf16.mxu1 %v1634_v0 }
 0x217   :  { %v529_v22 = vxor.u32 2147483648, %v528_v21 }
 0x219   :  { %v530_v23 = vsel %vm447_vm10, %v529_v22, %v528_v21  ;;  %1368 = vmatpush3.bf16.msra.mxu1 %v1526_v47 }
 0x21a   :  { %v533_v25 = vsel %vm446_vm11, %v1736_v31, %v530_v23  ;;  %1369 = vmatprep.subr.bf16.mxu1 %v1634_v0  ;;  %v1528_v31 = vld [vmem:[#allocation5 + $0x60] sm:$0xff]  }
 0x21b   :  { %1544 = vcosq.f32 %v533_v25 }
 0x21c   :  { %1546 = vsinq.f32 %v533_v25 }
 0x21d   :  { %1370 = vmatpush3.bf16.msra.mxu1 %v1527_v48 }
 0x21e   :  { %1371 = vmatprep.subr.bf16.mxu1 %v1634_v0 }
 0x221   :  { %1372 = vmatpush3.bf16.msra.mxu1 %v1528_v31 }
 0x222   :  { %1373 = vmatprep.subr.bf16.mxu1 %v1634_v0 }
 0x225   :  { %v1545_v29 = vpop.eup %1544  ;;  %1374 = vmatpush3.bf16.msra.mxu1 %v1529_v49 }
 0x226   :  { %v1547_v30 = vpop.eup %1546  ;;  %v545_v32 = vxor.u32 2147483648, %v1545_v29  ;;  %1375 = vmatprep.subr.bf16.mxu1 %v1634_v0 }
 0x227   :  { %v542_v34 = vxor.u32 2147483648, %v1547_v30 }
 0x228   :  { %v546_v36 = vsel %vm544_vm12, %v545_v32, %v1547_v30 }
 0x229   :  { %v543_v37 = vsel %vm541_vm13, %v1545_v29, %v542_v34  ;;  %1376 = vmatpush3.bf16.msra.mxu1 %v1530_v50 }
 0x22a   :  { %v547_v40 = vsel %vm540_vm14, %v543_v37, %v546_v36  ;;  %1377 = vmatprep.subr.bf16.mxu1 %v1634_v0 }
 0x22b   :  { %v548_v42 = vsel %vm537_vm15, nan, %v547_v40 }
 0x22c   :  { %v556_v43 = vmul.f32 %v1288_v38, %v548_v42 }
 0x22d   :  { %1378 = vmatpush3.bf16.msra.mxu1 %v1531_v52 }
 0x22e   :  { %v616_v44 = vpack.c.bf16 %v556_v43, %v556_v43 }
 0x230   :  { %852 = vmatmul.mubr.bf16.vlgmr.msra.gmra.mrb[8].mxu0 %v616_v44 }
 0x231   :  { %1399 = vmatprep.mubr.msk.bf16.mxu0 %vm1642_vm0, %v1634_v0  ;;  %1384 = vmatpush3.bf16.msra.mxu0 %v1532_v54 }
 0x232   :  { %1385 = vmatprep.subr.bf16.mxu0 %v1634_v0 }
 0x235   :  { %1386 = vmatpush3.bf16.msra.mxu0 %v1533_v55 }
 0x236   :  { %1387 = vmatprep.subr.bf16.mxu0 %v1634_v0 }
 0x239   :  { %1388 = vmatpush3.bf16.msra.mxu0 %v1534_v56 }
 0x23a   :  { %1389 = vmatprep.subr.bf16.mxu0 %v1634_v0 }
 0x23d   :  { %1390 = vmatpush3.bf16.msra.mxu0 %v1535_v58 }
 0x23e   :  { %1391 = vmatprep.subr.bf16.mxu0 %v1634_v0 }
 0x241   :  { %1392 = vmatpush3.bf16.msra.mxu0 %v1536_v59 }
 0x242   :  { %1393 = vmatprep.subr.bf16.mxu0 %v1634_v0 }
 0x245   :  { %1394 = vmatpush3.bf16.msra.mxu0 %v1537_v61 }
 0x246   :  { %1395 = vmatprep.subr.bf16.mxu0 %v1634_v0 }
 0x249   :  { %1396 = vmatpush3.bf16.msra.mxu0 %v1538_v62 }
 0x24a   :  { %1397 = vmatprep.subr.bf16.mxu0 %v1634_v0 }
 0x24d   :  { %1398 = vmatpush3.bf16.msra.mxu0 %v1539_v1 }
 0x2e3   :  { %v732_v2 = vpop.f32.mrb[4].mxu1 }
 0x2e4   :  { %v734_v4 = vpop.f32.mrb[5].mxu1 }
 0x2e5   :  { %v736_v5 = vpop.f32.mrb[6].mxu1 }
 0x2e6   :  { %v737_v6 = vpop.f32.mrb[7].mxu1 }
 0x303   :  { %v853_v9 = vpop.f32.mrb[8].mxu0 }
 0x304   :  { %v854_v11 = vadd.f32 %v853_v9, %v732_v2  ;;  %v855_v12 = vpop.f32.mrb[9].mxu0 }
 0x305   :  { %v856_v13 = vadd.f32 %v855_v12, %v734_v4  ;;  %v857_v14 = vpop.f32.mrb[10].mxu0 }
 0x306   :  { %v1800_v15 = vadd.f32 %v866_v8, %v854_v11  ;;  %v858_v0 = vpop.f32.mrb[11].mxu0 }
 0x307   :  { %v1802_v16 = vadd.f32 %v870_v10, %v856_v13 }
 0x308   :  { %v878_v17 = vand.u32 2139095040, %v1800_v15  ;;  %v875_v19 = vand.u32 2147483647, %v1800_v15  ;;  %vm877_vm9 = vcmp.lt.s32.totalorder %v1800_v15, 0  ;;  %vm967_vm14 = vweird.f32 %v1800_v15 }
 0x309   :  { %v1806_v18 = vmul.f32 0.70710677, %v1802_v16 }
 0x30a   :  { %v879_v35 = vshrl.u32 %v878_v17, 23  ;;  %v882_v22 = vand.u32 8388607, %v875_v19  ;;  %vm876_vm10 = vcmp.le.f32.partialorder %v875_v19, 0.7853982 }
 0x30b   :  { %v990_v39 = vand.u32 2147483647, %v1806_v18  ;;  %vm1009_vm7 = vcmp.lt.f32.partialorder %v1806_v18, 0.0  ;;  %v1327_v19 = vld [vmem:[%s1863_s5 + $0x1] ss:$0 sm:$0xff]  ;;  %s1600_s5 = scalar_lea.vmem %s1240_s22, 128 }
 0x30c   :  { %v1322_v41 = vadd.s32 4294967169, %v879_v35  ;;  %v883_v25 = vor.u32 8388608, %v882_v22  ;;  %p1601_p2 = scmp.ne.s32.totalorder %s1240_s22, %s1600_s5  ;;  %p1606_p4 = scmp.lt.s32.totalorder %s1600_s5, %s1600_s5 }
 0x30d   :  { %v991_v20 = vmul.f32 0.3275911, %v990_v39  ;;  %v1003_v30 = vsub.f32 0.0, %v990_v39 }
 0x30e   :  { %v885_v21 = vadd.s32 1, %v1322_v41  ;;  %v923_v47 = vshll.u32 %v883_v25, 8  ;;  %p1607_p5 = por %p1606_p4, %p1605_p3 }
 0x30f   :  { %v992_v33 = vadd.f32 1.0, %v991_v20  ;;  %v1004_v50 = vmul.f32 %v1003_v30, %v990_v39 }
 0x310   :  { %vm886_vm1 = vcmp.gt.s32.totalorder %v885_v21, 0  ;;  %p1608_p6 = pnand %p1607_p5, %p1601_p2 }
 0x311   :  { %v887_v23 = vsel %vm886_vm1, %v885_v21, 0  ;;  %1548 = vrcp.f32 %v992_v33 }
 0x312   :  { %v889_v24 = vand.u32 31, %v887_v23  ;;  %v888_v27 = vshrl.u32 %v887_v23, 5 }
 0x314   :  { %v890_v26 = vsub.s32 32, %v889_v24  ;;  %v892_v28 = vshll.u32 %v1636_v51, %v889_v24  ;;  %v895_v29 = vshll.u32 %v1637_v53, %v889_v24  ;;  %v898_v36 = vshll.u32 %v1638_v57, %v889_v24 }
 0x315   :  { %v901_v38 = vshll.u32 %v1639_v60, %v889_v24  ;;  %v904_v42 = vshll.u32 %v1640_v63, %v889_v24  ;;  %vm907_vm2 = vcmp.lt.s32.totalorder %v888_v27, 1  ;;  %vm910_vm3 = vcmp.lt.s32.totalorder %v888_v27, 4 }
 0x316   :  { %v893_v32 = vshrl.u32 %v1637_v53, %v890_v26  ;;  %v896_v34 = vshrl.u32 %v1638_v57, %v890_v26  ;;  %v899_v37 = vshrl.u32 %v1639_v60, %v890_v26  ;;  %v902_v40 = vshrl.u32 %v1640_v63, %v890_v26 }
 0x317   :  { %v905_v43 = vshrl.u32 %v1641_v3, %v890_v26  ;;  %v891_v60 = vshrl.u32 %v1636_v51, %v890_v26  ;;  %vm909_vm4 = vcmp.lt.s32.totalorder %v888_v27, 3  ;;  %vm908_vm5 = vcmp.lt.s32.totalorder %v888_v27, 2 }
 0x318   :  { %v894_v44 = vor.u32 %v893_v32, %v892_v28  ;;  %v897_v45 = vor.u32 %v896_v34, %v895_v29  ;;  %v900_v46 = vor.u32 %v899_v37, %v898_v36  ;;  %v903_v48 = vor.u32 %v902_v40, %v901_v38 }
 0x319   :  { %v906_v53 = vor.u32 %v905_v43, %v904_v42  ;;  %v1005_v51 = vmul.f32 1.442695, %v1004_v50  ;;  %v988_v32 = vmul.f32 0.5, %v1802_v16 }
 0x31a   :  { %v912_v31 = vsel %vm910_vm3, %v900_v46, 2102212464  ;;  %v915_v57 = vsel %vm907_vm2, %v894_v44, %v897_v45  ;;  %v919_v49 = vsel %vm907_vm2, %v897_v45, %v900_v46  ;;  %v916_v54 = vsel %vm910_vm3, %v903_v48, 920167782 }
 0x31b   :  { %v1549_v52 = vpop.eup %1548  ;;  %v920_v63 = vsel %vm910_vm3, %v906_v53, 1326507024  ;;  %v917_v3 = vsel %vm909_vm4, %v900_v46, %v916_v54  ;;  %v911_v58 = vsel %vm907_vm2, %v891_v60, %v894_v44  ;;  %v913_v59 = vsel %vm909_vm4, %v897_v45, %v912_v31 }
 0x31c   :  { %v921_v55 = vsel %vm909_vm4, %v903_v48, %v920_v63  ;;  %v994_v56 = vmul.f32 1.0614054, %v1549_v52  ;;  %v918_v61 = vsel %vm908_vm5, %v915_v57, %v917_v3  ;;  %v914_v7 = vsel %vm908_vm5, %v911_v58, %v913_v59 }
 0x31d   :  { %v922_v62 = vsel %vm908_vm5, %v919_v49, %v921_v55  ;;  %v1826_v4 = vmul.u32.u64.low %v923_v47, %v918_v61  ;;  %v1827_v5 = vmul.u32.u64.high %v923_v47, %v918_v61, %v1826_v4  ;;  %v930_v10 = vmul.u32 %v923_v47, %v914_v7 }
 0x31e   :  { %v1823_v1 = vmul.u32.u64.low %v923_v47, %v922_v62  ;;  %v1824_v2 = vmul.u32.u64.high %v923_v47, %v922_v62, %v1823_v1  ;;  %v995_v6 = vadd.f32 -1.4531521, %v994_v56  ;;  %1550 = vpow2.f32 %v1005_v51 }
 0x31f   :  { %v933_v9 = vadd.s32 1, %v1827_v5 }
 0x320   :  { %v996_v8 = vmul.f32 %v1549_v52, %v995_v6  ;;  %vm932_vm6 = vc.u32 %v1824_v2, %v1826_v4  ;;  %v931_v38 = vadd.s32 %v1826_v4, %v1824_v2 }
 0x321   :  { %v934_v12 = vsel %vm932_vm6, %v933_v9, %v1827_v5 }
 0x322   :  { %v997_v11 = vadd.f32 1.4214138, %v996_v8  ;;  %v935_v13 = vadd.s32 %v934_v12, %v930_v10  ;;  %v1344_v10 = vld [vmem:[%s1865_s7] ss:$0 sm:$0xff] }
 0x324   :  { %v998_v14 = vmul.f32 %v1549_v52, %v997_v11  ;;  %v936_v0 = vadd.s32 536870912, %v935_v13 }
 0x326   :  { %v999_v17 = vadd.f32 -0.28449672, %v998_v14  ;;  %v937_v35 = vshrl.u32 %v936_v0, 30 }
 0x328   :  { %v1000_v39 = vmul.f32 %v1549_v52, %v999_v17  ;;  %v938_v41 = vshll.u32 %v937_v35, 30  ;;  %v1551_v22 = vpop.eup %1550  ;;  %v961_v16 = vsub.s32 4, %v937_v35 }
 0x32a   :  { %v1001_v20 = vadd.f32 0.2548296, %v1000_v39  ;;  %v939_v21 = vsub.s32 %v935_v13, %v938_v41 }
 0x32c   :  { %v1002_v33 = vmul.f32 %v1549_v52, %v1001_v20  ;;  %v941_v23 = vsub.s32 0, %v939_v21  ;;  %v962_v52 = vsel %vm877_vm9, %v961_v16, %v937_v35 }
 0x32d   :  { %v964_v54 = vsel %vm876_vm10, 0, %v962_v52 }
 0x32e   :  { %v1007_v24 = vmul.f32 %v1551_v22, %v1002_v33  ;;  %v1323_v25 = vmin.u32 %v941_v23, %v939_v21  ;;  %v968_v63 = vadd.s32 3, %v964_v54 }
 0x330   :  { %v1008_v26 = vsub.f32 1.0, %v1007_v24  ;;  %v943_v27 = vclz %v1323_v25  ;;  %v969_v3 = vand.u32 3, %v968_v63 }
 0x332   :  { %v1010_v28 = vsub.f32 0.0, %v1008_v26  ;;  %v1324_v29 = vadd.s32 4294967294, %v943_v27  ;;  %vm974_vm11 = vcmp.eq.s32.totalorder %v969_v3, 2  ;;  %vm971_vm12 = vcmp.eq.s32.totalorder %v969_v3, 0 }
 0x333   :  { %vm970_vm13 = vcmp.lt.s32.totalorder %v969_v3, 2 }
 0x334   :  { %v1011_v30 = vsel %vm1009_vm7, %v1010_v28, %v1008_v26  ;;  %vm1325_vm8 = vcmp.lt.s32.totalorder %v1324_v29, 0 }
 0x335   :  { %v1012_v34 = vadd.f32 1.0, %v1011_v30  ;;  %v946_v36 = vsel %vm1325_vm8, 0, %v1324_v29 }
 0x336   :  { %v947_v40 = vsub.s32 32, %v946_v36  ;;  %v951_v42 = vsub.s32 4294967266, %v946_v36  ;;  %v948_v44 = vshll.u32 %v939_v21, %v946_v36 }
 0x337   :  { %v1013_v37 = vmul.f32 %v1012_v34, %v988_v32 }
 0x338   :  { %v949_v45 = vshrl.u32 %v931_v38, %v947_v40  ;;  %v952_v46 = vadd.s32 127, %v951_v42 }
 0x339   :  { %v1047_v43 = vpack.c.bf16 %v1013_v37, %v1013_v37 }
 0x33a   :  { %v950_v47 = vor.u32 %v949_v45, %v948_v44  ;;  %v953_v48 = vshll.u32 %v952_v46, 23 }
 0x33b   :  { %1380 = vmatmul.mubr.bf16.vlgmr.msra.gmra.mrb[8].mxu1 %v1047_v43 }
 0x33c   :  { %v954_v18 = vor.u32 4788187, %v953_v48  ;;  %v957_v31 = vcvt.s32.f32 %v950_v47 }
 0x33e   :  { %v955_v53 = vand.u32 2147483647, %v954_v18 }
 0x340   :  { %v958_v57 = vmul.f32 %v957_v31, %v955_v53 }
 0x342   :  { %v959_v49 = vxor.u32 2147483648, %v958_v57 }
 0x344   :  { %v960_v50 = vsel %vm877_vm9, %v959_v49, %v958_v57 }
 0x345   :  { %v963_v60 = vsel %vm876_vm10, %v1800_v15, %v960_v50 }
 0x346   :  { %1552 = vcosq.f32 %v963_v60 }
 0x347   :  { %1554 = vsinq.f32 %v963_v60 }
 0x350   :  { %v1553_v55 = vpop.eup %1552 }
 0x351   :  { %v1555_v56 = vpop.eup %1554  ;;  %v975_v58 = vxor.u32 2147483648, %v1553_v55 }
 0x352   :  { %v972_v59 = vxor.u32 2147483648, %v1555_v56 }
 0x353   :  { %v976_v61 = vsel %vm974_vm11, %v975_v58, %v1555_v56 }
 0x354   :  { %v973_v62 = vsel %vm971_vm12, %v1553_v55, %v972_v59 }
 0x355   :  { %v977_v1 = vsel %vm970_vm13, %v973_v62, %v976_v61 }
 0x356   :  { %v978_v2 = vsel %vm967_vm14, nan, %v977_v1 }
 0x357   :  { %v987_v4 = vmul.f32 %v1327_v19, %v978_v2 }
 0x359   :  { %v1046_v5 = vpack.c.bf16 %v987_v4, %v987_v4 }
 0x35b   :  { %1400 = vmatmul.mubr.bf16.vlgmr.msra.gmra.mrb[12].mxu0 %v1046_v5 }
 0x40e   :  { %v1130_v6 = vpop.f32.mrb[8].mxu1 }
 0x40f   :  { %v1381_v7 = vpop.f32.mrb[9].mxu1 }
 0x410   :  { %v1133_v51 = vpop.f32.mrb[10].mxu1 }
 0x411   :  { %v1382_v8 = vpop.f32.mrb[11].mxu1 }
 0x42e   :  { %v1218_v9 = vpop.f32.mrb[12].mxu0 }
 0x42f   :  { %v1219_v11 = vadd.f32 %v1218_v9, %v1130_v6  ;;  %v1401_v12 = vpop.f32.mrb[13].mxu0 }
 0x430   :  { %v1221_v13 = vpop.f32.mrb[14].mxu0 }
 0x431   :  { %v1231_v15 = vadd.f32 %v1344_v10, %v1219_v11  ;;  %v1402_v14 = vpop.f32.mrb[15].mxu0 }
 0x433   :  { %1232 = vst [vmem:[#allocation7] sm:$0xff] %v1231_v15 }
 0x434   :  { %1611 = shalt.err (!%p1608_p6)
}
 0x435   :  { %s1612_s7 = scalar_lea.hbm %s1866_s8, 128 }
 0x436   :  { %p1613_p7 = scmp.ne.s32.totalorder %s1866_s8, %s1612_s7  ;;  %p1616_p8 = scmp.lt.u32.totalorder %s1612_s7, %s1866_s8 }
 0x438   :  { %p1618_p9 = pnand %p1616_p8, %p1613_p7 }
 0x43a   :  { %1621 = shalt.err (!%p1618_p9)
}
 0x43b   :  { %1242 = dma.vmem_to_hbm [thread:$0]  %s1240_s22, 128, %s1866_s8, [#allocation4]  }
 0x43c   :  { %1626 = dma.done.wait [#allocation4], 128  }
 0x43d   :  { %1627 = vsyncadd [#allocation4], 4294967168 }
 0x43e   :  { %1246 = vsyncpa [#allocation3], 1 }
 0x43f   :  { %1247 = vsyncpa [#allocation6], 1 }
 0x440   :  { %1248 = vsyncpa [#allocation4], 1 }

</bundles_post_ra>
